<compile_context>
chip_gen: v7x
topology: tpu7x:2x2x1
jax: 0.10.0
libtpu: 0.0.40
codegen_flags: <defaults>
</compile_context>

<pallas_src>
import numpy as np

import jax
import jax.numpy as jnp
from jax.experimental import pallas as pl
from jax.experimental.pallas import tpu as pltpu


# -----------------------------------------------------------------------------
# Kernel: one batch tile through Linear -> Tanh -> Linear -> Tanh -> Linear.
# Weights / biases use a constant index_map so they stay VMEM-resident across
# the whole grid; only the x tile and output tile stream through HBM.
# -----------------------------------------------------------------------------
def mlp_kernel(x_ref, w1_ref, b1_ref, w2_ref, b2_ref, w3_ref, b3_ref, o_ref):
    cdt = w1_ref.dtype                       # MXU operand dtype (bf16 or f32)
    x = x_ref[...].astype(cdt)               # in-kernel cast: no extra HBM pass
    h = jnp.tanh(
        jnp.dot(x, w1_ref[...], preferred_element_type=jnp.float32) + b1_ref[...]
    )
    h = jnp.tanh(
        jnp.dot(h.astype(cdt), w2_ref[...], preferred_element_type=jnp.float32)
        + b2_ref[...]
    )
    y = (
        jnp.dot(h.astype(cdt), w3_ref[...], preferred_element_type=jnp.float32)
        + b3_ref[...]
    )
    o_ref[...] = y.astype(o_ref.dtype)


# -----------------------------------------------------------------------------
# Helpers
# -----------------------------------------------------------------------------
def _round_up(n, m):
    return ((n + m - 1) // m) * m


def _cdiv(a, b):
    return -(-a // b)


def _device_kind():
    try:
        return jax.devices()[0].device_kind.lower()
    except Exception:
        return ""


def _on_tpu():
    try:
        return jax.devices()[0].platform == "tpu"
    except Exception:
        return False


# -----------------------------------------------------------------------------
# Builder: hoists param padding / casting out of the per-call path and returns
# a jitted forward(x) -> (B, d_out) function.
# -----------------------------------------------------------------------------
def make_base_model_forward(params, *, batch_tile=1024, use_bf16=None,
                            out_dtype=jnp.float32):
    w1, b1, w2, b2, w3, b3 = params
    d_in = w1.shape[0]
    h1, h2, d_out = w1.shape[1], w2.shape[1], w3.shape[1]

    if use_bf16 is None:
        # bf16 MXU operands are a win on v5e, v6e and v7x alike (accumulation
        # stays f32 via preferred_element_type); fall back to f32 off-TPU.
        use_bf16 = _on_tpu()
    cdt = jnp.bfloat16 if use_bf16 else jnp.float32

    # Only the OUTPUT feature dim needs 128-lane padding (lane-dense store);
    # hidden dims stay unpadded — intermediates never leave VMEM/vregs.
    d_out_p = _round_up(d_out, 128)

    # One-time param prep (padding + cast), reused across every forward call.
    w1c = jnp.asarray(w1).astype(cdt)
    w2c = jnp.asarray(w2).astype(cdt)
    w3c = jnp.pad(jnp.asarray(w3), ((0, 0), (0, d_out_p - d_out))).astype(cdt)
    # Biases stay f32: they are added onto the f32 accumulator.
    b1c = jnp.asarray(b1).reshape(1, h1).astype(jnp.float32)
    b2c = jnp.asarray(b2).reshape(1, h2).astype(jnp.float32)
    b3c = jnp.pad(jnp.asarray(b3).reshape(1, d_out),
                  ((0, 0), (0, d_out_p - d_out))).astype(jnp.float32)

    two_cores = "v7" in _device_kind()   # v7x: 2 TensorCores per chip
    out_itemsize = np.dtype(out_dtype).itemsize

    @jax.jit
    def forward(x):
        B = x.shape[0]

        # Effective tile: as large as requested, but never pad the batch past
        # the next sublane multiple.  On v7x, keep the "parallel" grid even
        # when B spans >1 tile so both TensorCores get work.
        tile = _round_up(min(batch_tile, _round_up(B, 8)), 8)
        if two_cores and B > tile:
            n = _cdiv(B, tile)
            if n % 2:
                tile = _round_up(_cdiv(B, n + 1), 8)
        num_tiles = _cdiv(B, tile)
        Bp = num_tiles * tile
        xk = x if Bp == B else jnp.pad(x, ((0, Bp - B), (0, 0)))

        # v5e's default scoped VMEM is only 16 MiB; bump it for huge tiles
        # (double-buffered x + output tiles dominate).
        stream_bytes = 2 * tile * (d_in * x.dtype.itemsize + d_out_p * out_itemsize)
        vmem_limit = None
        if stream_bytes > 12 * 1024 * 1024:
            vmem_limit = min(int(1.5 * stream_bytes) + (4 << 20), 96 << 20)

        const = lambda shape: pl.BlockSpec(shape, lambda i: (0, 0))

        out_padded = pl.pallas_call(
            mlp_kernel,
            out_shape=jax.ShapeDtypeStruct((Bp, d_out_p), out_dtype),
            grid=(num_tiles,),
            in_specs=[
                pl.BlockSpec((tile, d_in), lambda i: (i, 0)),   # streamed x tile
                const(w1c.shape), const(b1c.shape),
                const(w2c.shape), const(b2c.shape),
                const(w3c.shape), const(b3c.shape),
            ],
            out_specs=pl.BlockSpec((tile, d_out_p), lambda i: (i, 0)),
            compiler_params=pltpu.CompilerParams(
                dimension_semantics=("parallel",),
                vmem_limit_bytes=vmem_limit,
            ),
        )(xk, w1c, b1c, w2c, b2c, w3c, b3c)

        # Slice padded batch rows / feature columns off before anything downstream.
        return out_padded[:B, :d_out]

    return forward


def base_model_forward(x, params, **kwargs):
    """Convenience one-shot wrapper (builds + calls; prefer make_base_model_forward
    when calling repeatedly so padding/casting/jit happen once)."""
    return make_base_model_forward(params, **kwargs)(x)


# -----------------------------------------------------------------------------
# Reference + init
# -----------------------------------------------------------------------------
def init_params(key, input_dim, hidden_dims, output_dim):
    """Deterministic synthetic init (PyTorch-Linear-like uniform fan-in scaling)."""
    dims = [input_dim] + list(hidden_dims) + [output_dim]
    params = []
    for i in range(len(dims) - 1):
        key, kw, kb = jax.random.split(key, 3)
        bound = 1.0 / float(np.sqrt(dims[i]))
        w = jax.random.uniform(kw, (dims[i], dims[i + 1]), jnp.float32, -bound, bound)
        b = jax.random.uniform(kb, (1, dims[i + 1]), jnp.float32, -bound, bound)
        params += [w, b]
    return tuple(params)


def reference_forward(x, params):
    w1, b1, w2, b2, w3, b3 = params
    h = jnp.tanh(x @ w1 + b1)
    h = jnp.tanh(h @ w2 + b2)
    return h @ w3 + b3


if __name__ == "__main__":
    # Small shapes implied by the module: input_dim (e.g. t for an ODE), two
    # hidden layers of 64, output_dim (e.g. y for an ODE).
    input_dim, output_dim = 4, 3
    hidden_dims = [64, 64]
    batch = 16

    key = jax.random.PRNGKey(0)
    key, kx = jax.random.split(key)
    x = jax.random.normal(kx, (batch, input_dim), jnp.float32)
    params = init_params(key, input_dim, hidden_dims, output_dim)

    forward = make_base_model_forward(params, batch_tile=1024)
    out = jax.block_until_ready(forward(x))

    ref = reference_forward(x, params)
    assert out.shape == (batch, output_dim)
    use_bf16 = _on_tpu()
    tol = 5e-2 if use_bf16 else 1e-5  # bf16 MXU operands lose mantissa bits
    assert jnp.allclose(out, ref, atol=tol, rtol=tol), (
        float(jnp.max(jnp.abs(out - ref)))
    )

    print("KERNEL_OK")
</pallas_src>

<mosaic_0001>
module attributes {stable_mosaic.version = 11 : i64} {
  func.func @mlp_kernel(%arg0: i32, %arg1: memref<16x4xf32, #tpu.memory_space<vmem>>, %arg2: memref<4x64xf32, #tpu.memory_space<vmem>>, %arg3: memref<1x64xf32, #tpu.memory_space<vmem>>, %arg4: memref<64x64xf32, #tpu.memory_space<vmem>>, %arg5: memref<1x64xf32, #tpu.memory_space<vmem>>, %arg6: memref<64x128xf32, #tpu.memory_space<vmem>>, %arg7: memref<1x128xf32, #tpu.memory_space<vmem>>, %arg8: memref<16x128xf32, #tpu.memory_space<vmem>>) attributes {dimension_semantics = [#tpu.dimension_semantics<parallel>], iteration_bounds = array<i64: 1>, scalar_prefetch = 0 : i64, scratch_operands = 0 : i64, tpu.core_type = #tpu.core_type<tc>, window_params = [{transform_indices = @transform_0, window_bounds = array<i64: 16, 4>}, {pipeline_mode = #tpu.pipeline_mode<synchronous>, transform_indices = @transform_1, window_bounds = array<i64: 4, 64>}, {pipeline_mode = #tpu.pipeline_mode<synchronous>, transform_indices = @transform_2, window_bounds = array<i64: 1, 64>}, {pipeline_mode = #tpu.pipeline_mode<synchronous>, transform_indices = @transform_3, window_bounds = array<i64: 64, 64>}, {pipeline_mode = #tpu.pipeline_mode<synchronous>, transform_indices = @transform_4, window_bounds = array<i64: 1, 64>}, {pipeline_mode = #tpu.pipeline_mode<synchronous>, transform_indices = @transform_5, window_bounds = array<i64: 64, 128>}, {pipeline_mode = #tpu.pipeline_mode<synchronous>, transform_indices = @transform_6, window_bounds = array<i64: 1, 128>}, {transform_indices = @transform_7, window_bounds = array<i64: 16, 128>}]} {
    %c0 = arith.constant 0 : index
    %c0_0 = arith.constant 0 : index
    %0 = vector.load %arg1[%c0, %c0_0] : memref<16x4xf32, #tpu.memory_space<vmem>>, vector<16x4xf32>
    %c0_1 = arith.constant 0 : index
    %c0_2 = arith.constant 0 : index
    %1 = vector.load %arg2[%c0_1, %c0_2] : memref<4x64xf32, #tpu.memory_space<vmem>>, vector<4x64xf32>
    %cst = arith.constant dense<0.000000e+00> : vector<16x64xf32>
    %2 = tpu.matmul %0, %1, %cst {dimension_numbers = #tpu.dot_dimension_numbers<[1], [0], [0], [1], [0, 0, 1, 1], [], []>} : vector<16x4xf32>, vector<4x64xf32>, vector<16x64xf32> -> vector<16x64xf32>
    %c0_3 = arith.constant 0 : index
    %c0_4 = arith.constant 0 : index
    %3 = vector.load %arg3[%c0_3, %c0_4] : memref<1x64xf32, #tpu.memory_space<vmem>>, vector<1x64xf32>
    %4 = vector.broadcast %3 : vector<1x64xf32> to vector<16x64xf32>
    %5 = arith.addf %2, %4 : vector<16x64xf32>
    %6 = math.tanh %5 : vector<16x64xf32>
    %c0_5 = arith.constant 0 : index
    %c0_6 = arith.constant 0 : index
    %7 = vector.load %arg4[%c0_5, %c0_6] : memref<64x64xf32, #tpu.memory_space<vmem>>, vector<64x64xf32>
    %cst_7 = arith.constant dense<0.000000e+00> : vector<16x64xf32>
    %8 = tpu.matmul %6, %7, %cst_7 {dimension_numbers = #tpu.dot_dimension_numbers<[1], [0], [0], [1], [0, 0, 1, 1], [], []>} : vector<16x64xf32>, vector<64x64xf32>, vector<16x64xf32> -> vector<16x64xf32>
    %c0_8 = arith.constant 0 : index
    %c0_9 = arith.constant 0 : index
    %9 = vector.load %arg5[%c0_8, %c0_9] : memref<1x64xf32, #tpu.memory_space<vmem>>, vector<1x64xf32>
    %10 = vector.broadcast %9 : vector<1x64xf32> to vector<16x64xf32>
    %11 = arith.addf %8, %10 : vector<16x64xf32>
    %12 = math.tanh %11 : vector<16x64xf32>
    %c0_10 = arith.constant 0 : index
    %c0_11 = arith.constant 0 : index
    %13 = vector.load %arg6[%c0_10, %c0_11] : memref<64x128xf32, #tpu.memory_space<vmem>>, vector<64x128xf32>
    %cst_12 = arith.constant dense<0.000000e+00> : vector<16x128xf32>
    %14 = tpu.matmul %12, %13, %cst_12 {dimension_numbers = #tpu.dot_dimension_numbers<[1], [0], [0], [1], [0, 0, 1, 1], [], []>} : vector<16x64xf32>, vector<64x128xf32>, vector<16x128xf32> -> vector<16x128xf32>
    %c0_13 = arith.constant 0 : index
    %c0_14 = arith.constant 0 : index
    %15 = vector.load %arg7[%c0_13, %c0_14] : memref<1x128xf32, #tpu.memory_space<vmem>>, vector<1x128xf32>
    %16 = vector.broadcast %15 : vector<1x128xf32> to vector<16x128xf32>
    %17 = arith.addf %14, %16 : vector<16x128xf32>
    %c0_15 = arith.constant 0 : index
    %c0_16 = arith.constant 0 : index
    %18 = vector.load %arg8[%c0_15, %c0_16] : memref<16x128xf32, #tpu.memory_space<vmem>>, vector<16x128xf32>
    tpu.vector_store %arg8[%c0_15, %c0_16], %17 {strides = array<i32>} : memref<16x128xf32, #tpu.memory_space<vmem>>, vector<16x128xf32>,
    return
  }
  func.func @transform_0(%arg0: i32) -> (i32, i32) {
    %c0_i32 = arith.constant 0 : i32
    %c0_i32_0 = arith.constant 0 : i32
    return %arg0, %c0_i32 : i32, i32
  }
  func.func @transform_1(%arg0: i32) -> (i32, i32) {
    %c0_i32 = arith.constant 0 : i32
    %c0_i32_0 = arith.constant 0 : i32
    %c0_i32_1 = arith.constant 0 : i32
    return %c0_i32, %c0_i32_0 : i32, i32
  }
  func.func @transform_2(%arg0: i32) -> (i32, i32) {
    %c0_i32 = arith.constant 0 : i32
    %c0_i32_0 = arith.constant 0 : i32
    %c0_i32_1 = arith.constant 0 : i32
    return %c0_i32, %c0_i32_0 : i32, i32
  }
  func.func @transform_3(%arg0: i32) -> (i32, i32) {
    %c0_i32 = arith.constant 0 : i32
    %c0_i32_0 = arith.constant 0 : i32
    %c0_i32_1 = arith.constant 0 : i32
    return %c0_i32, %c0_i32_0 : i32, i32
  }
  func.func @transform_4(%arg0: i32) -> (i32, i32) {
    %c0_i32 = arith.constant 0 : i32
    %c0_i32_0 = arith.constant 0 : i32
    %c0_i32_1 = arith.constant 0 : i32
    return %c0_i32, %c0_i32_0 : i32, i32
  }
  func.func @transform_5(%arg0: i32) -> (i32, i32) {
    %c0_i32 = arith.constant 0 : i32
    %c0_i32_0 = arith.constant 0 : i32
    %c0_i32_1 = arith.constant 0 : i32
    return %c0_i32, %c0_i32_0 : i32, i32
  }
  func.func @transform_6(%arg0: i32) -> (i32, i32) {
    %c0_i32 = arith.constant 0 : i32
    %c0_i32_0 = arith.constant 0 : i32
    %c0_i32_1 = arith.constant 0 : i32
    return %c0_i32, %c0_i32_0 : i32, i32
  }
  func.func @transform_7(%arg0: i32) -> (i32, i32) {
    %c0_i32 = arith.constant 0 : i32
    %c0_i32_0 = arith.constant 0 : i32
    return %arg0, %c0_i32 : i32, i32
  }
}

</mosaic_0001>

<bundles_post_ra>
// kernel: forward.1
= control target key start
LH: loop header
LB: loop body
LE: loop exit
PB: predicated region body
PF: predicated region fallthrough
CT: control target
= control target key end

     0   :  { %12 = vsyncpa [#allocation3], 0  ;;  %s619_s0 = inlined_call_operand.vmem [shape: f32[16,4], index: 0, kind: input, shape index: {}]   ;;  %s620_s1 = inlined_call_operand.vmem [shape: f32[4,64], index: 1, kind: input, shape index: {}]   ;;  %s621_s2 = inlined_call_operand.vmem [shape: f32[1,64], index: 2, kind: input, shape index: {}]   ;;  %s622_s3 = inlined_call_operand.hbm [shape: f32[64,64], index: 3, kind: input, shape index: {}]   ;;  %s623_s4 = inlined_call_operand.vmem [shape: f32[1,64], index: 4, kind: input, shape index: {}]   ;;  %s624_s5 = inlined_call_operand.hbm [shape: f32[64,128], index: 5, kind: input, shape index: {}]   ;;  %s625_s6 = inlined_call_operand.vmem [shape: f32[1,128], index: 6, kind: input, shape index: {}]   ;;  %s626_s7 = inlined_call_operand.vmem [shape: f32[16,128], index: 7, kind: output, shape index: {}]  }
   0x1   :  { %13 = vsyncpa [#allocation5], 0  ;;  %s523_s24 = smov [#allocation2]   ;;  %s475_s28 = scalar_lea.hbm %s622_s3, 1024 }
   0x2   :  { %s25_s25 = sshll.u32 %s523_s24, 4  ;;  %p476_p0 = scmp.ne.s32.totalorder %s622_s3, %s475_s28  ;;  %s26_s25 = int_to_ptr.vmem [resolvable:$true] %s25_s25 }
   0x3   :  { %p479_p1 = scmp.lt.u32.totalorder %s475_s28, %s622_s3 }
   0x5   :  { %p481_p2 = pnand %p479_p1, %p476_p0 }
   0x7   :  { %484 = shalt.err (!%p481_p2)
}
   0x8   :  { %s485_s10 = scalar_lea.vmem %s26_s25, 1024  ;;  %p490_p4 = scmp.lt.s32.totalorder %s26_s25, %s26_s25 }
   0x9   :  { %p486_p3 = scmp.ne.s32.totalorder %s26_s25, %s485_s10  ;;  %p491_p5 = scmp.lt.s32.totalorder %s485_s10, %s485_s10 }
   0xb   :  { %p492_p6 = por %p491_p5, %p490_p4 }
   0xd   :  { %p493_p7 = pnand %p492_p6, %p486_p3 }
   0xf   :  { %496 = shalt.err (!%p493_p7)
}
  0x10   :  { %s524_s11 = smov 128   ;;  %s525_s12 = smov 8  }
  0x11   :  { %31 = dma.hbm_to_vmem [thread:$0]  %s622_s3, 1024, %s26_s25, [#allocation3], %s524_s11, %s524_s11, %s525_s12  }
  0x12   :  { %s526_s15 = smov [#allocation4]   ;;  %s497_s19 = scalar_lea.hbm %s624_s5, 1024 }
  0x13   :  { %s39_s16 = sshll.u32 %s526_s15, 4  ;;  %p498_p8 = scmp.ne.s32.totalorder %s624_s5, %s497_s19  ;;  %s40_s16 = int_to_ptr.vmem [resolvable:$true] %s39_s16 }
  0x14   :  { %p501_p9 = scmp.lt.u32.totalorder %s497_s19, %s624_s5 }
  0x16   :  { %p503_p10 = pnand %p501_p9, %p498_p8 }
  0x18   :  { %506 = shalt.err (!%p503_p10)
}
  0x19   :  { %s507_s24 = scalar_lea.vmem %s40_s16, 1024  ;;  %p512_p12 = scmp.lt.s32.totalorder %s40_s16, %s40_s16 }
  0x1a   :  { %p508_p11 = scmp.ne.s32.totalorder %s40_s16, %s507_s24  ;;  %p513_p13 = scmp.lt.s32.totalorder %s507_s24, %s507_s24 }
  0x1c   :  { %p514_p0 = por %p513_p13, %p512_p12 }
  0x1e   :  { %p515_p1 = pnand %p514_p0, %p508_p11 }
  0x20   :  { %518 = shalt.err (!%p515_p1)
}
  0x21   :  { %45 = dma.hbm_to_vmem [thread:$0]  %s624_s5, 1024, %s40_s16, [#allocation5], %s524_s11, %s524_s11, %s525_s12  }
  0x22   :  { %519 = dma.done.wait [#allocation3], 1024  }
  0x23   :  { %520 = vsyncadd [#allocation3], 4294966272 }
  0x24   :  { %521 = dma.done.wait [#allocation5], 1024  }
  0x25   :  { %522 = vsyncadd [#allocation5], 4294966272  ;;  %vm71_vm0 = vcmask 1043456   ;;  %vm64_vm1 = vcmask 31744   ;;  %v56_v0 = vld [vmem:[%s620_s1] sm:$0xf] }
  0x26   :  { %v54_v1 = vld [vmem:[%s619_s0] sm:$0xff]  ;;  %v55_v2 = vld [vmem:[%s619_s0 + $0x8] sm:$0xff]  ;;  %388 = vmatprep.subr.msk.mxu0 %vm71_vm0, %v56_v0  ;;  %v154_v6 = vld [vmem:[#allocation2 + $0x10] sm:$0xff]  ;;  %vm167_vm2 = vcmask 523264  }
  0x27   :  { %390 = vmatprep.mubr.msk.f32.mxu0 %vm64_vm1, %v54_v1  ;;  %389 = vmatpush3.msk.msra.mxu0 %vm71_vm0, %v56_v0  ;;  %v152_v3 = vld [vmem:[#allocation2] sm:$0xff]  ;;  %v153_v4 = vld [vmem:[#allocation2 + $0x8] sm:$0xff]  ;;  %v155_v7 = vld [vmem:[#allocation2 + $0x18] sm:$0xff] }
  0x28   :  { %391 = vmatmul.mubr.msk.f32.vlgmr.msra.gmra.mrb[0].mxu0 %vm64_vm1, %v55_v2  ;;  %v431_v5 = vpack.c.bf16 %v153_v4, %v152_v3  ;;  %v435_v8 = vpack.c.bf16 %v155_v7, %v154_v6  ;;  %v156_v9 = vld [vmem:[#allocation2 + $0x20] sm:$0xff]  ;;  %v157_v10 = vld [vmem:[#allocation2 + $0x28] sm:$0xff]  ;;  %v158_v11 = vld [vmem:[#allocation2 + $0x30] sm:$0xff] }
  0x29   :  { %v439_v12 = vpack.c.bf16 %v157_v10, %v156_v9  ;;  %v159_v13 = vld [vmem:[#allocation2 + $0x38] sm:$0xff]  ;;  %v355_v15 = vld [vmem:[%s621_s2] ss:$0 sm:$0xff]  ;;  %v252_v23 = vld [vmem:[#allocation4 + $0x8] sm:$0xff] }
  0x2a   :  { %432 = vmatprep.subr.bf16.mxu1 %v431_v5  ;;  %v443_v14 = vpack.c.bf16 %v159_v13, %v158_v11  ;;  %v251_v22 = vld [vmem:[#allocation4] sm:$0xff]  ;;  %v253_v25 = vld [vmem:[#allocation4 + $0x10] sm:$0xff]  ;;  %v254_v26 = vld [vmem:[#allocation4 + $0x18] sm:$0xff] }
  0x2b   :  { %434 = vmatpush3.bf16.msra.mxu1 %v431_v5  ;;  %v447_v24 = vpack.c.bf16 %v252_v23, %v251_v22  ;;  %v451_v27 = vpack.c.bf16 %v254_v26, %v253_v25  ;;  %v255_v28 = vld [vmem:[#allocation4 + $0x20] sm:$0xff]  ;;  %v256_v29 = vld [vmem:[#allocation4 + $0x28] sm:$0xff]  ;;  %v257_v30 = vld [vmem:[#allocation4 + $0x30] sm:$0xff] }
  0x2c   :  { %436 = vmatprep.subr.bf16.mxu1 %v435_v8  ;;  %v455_v31 = vpack.c.bf16 %v256_v29, %v255_v28  ;;  %v258_v32 = vld [vmem:[#allocation4 + $0x38] sm:$0xff]  ;;  %v359_v34 = vld [vmem:[%s623_s4] ss:$0 sm:$0xff] }
  0x2d   :  { %448 = vmatprep.subr.bf16.mxu0 %v447_v24  ;;  %v459_v33 = vpack.c.bf16 %v258_v32, %v257_v30  ;;  %v362_v41 = vld [vmem:[%s625_s6] ss:$0 sm:$0xff] }
  0x2e   :  { %450 = vmatpush3.bf16.msra.mxu0 %v447_v24 }
  0x2f   :  { %438 = vmatpush3.bf16.msra.mxu1 %v435_v8  ;;  %452 = vmatprep.subr.bf16.mxu0 %v451_v27 }
  0x30   :  { %440 = vmatprep.subr.bf16.mxu1 %v439_v12 }
  0x32   :  { %454 = vmatpush3.bf16.msra.mxu0 %v451_v27 }
  0x33   :  { %442 = vmatpush3.bf16.msra.mxu1 %v439_v12  ;;  %456 = vmatprep.subr.bf16.mxu0 %v455_v31 }
  0x34   :  { %444 = vmatprep.subr.bf16.mxu1 %v443_v14 }
  0x36   :  { %458 = vmatpush3.bf16.msra.mxu0 %v455_v31 }
  0x37   :  { %446 = vmatpush3.bf16.msra.mxu1 %v443_v14  ;;  %460 = vmatprep.subr.bf16.mxu0 %v459_v33 }
  0x3a   :  { %462 = vmatpush3.bf16.msra.mxu0 %v459_v33 }
  0xfb   :  { %v392_v16 = vpop.f32.mrb[0].mxu0 }
  0xfc   :  { %v147_v17 = vadd.f32 %v392_v16, %v355_v15  ;;  %v141_v18 = vpop.f32.mrb[1].mxu0 }
  0xfd   :  { %v142_v19 = vadd.f32 %v355_v15, %v141_v18 }
  0xff   :  { %467 = vtanh.f32 %v142_v19 }
 0x100   :  { %469 = vtanh.f32 %v147_v17 }
 0x109   :  { %v468_v20 = vpop.eup %467 }
 0x10a   :  { %v470_v21 = vpop.eup %469  ;;  %409 = vmatprep.mubr.msk.f32.mxu1 %vm167_vm2, %v468_v20 }
 0x10b   :  { %410 = vmatmul.mubr.msk.f32.vlgmr.msra.gmra.mrb[0].mxu1 %vm167_vm2, %v470_v21 }
 0x1de   :  { %v411_v35 = vpop.f32.mrb[0].mxu1 }
 0x1df   :  { %v246_v36 = vadd.f32 %v411_v35, %v359_v34  ;;  %v240_v37 = vpop.f32.mrb[1].mxu1 }
 0x1e0   :  { %v241_v38 = vadd.f32 %v359_v34, %v240_v37 }
 0x1e2   :  { %471 = vtanh.f32 %v241_v38 }
 0x1e3   :  { %473 = vtanh.f32 %v246_v36 }
 0x1ec   :  { %v472_v39 = vpop.eup %471 }
 0x1ed   :  { %v474_v40 = vpop.eup %473  ;;  %428 = vmatprep.mubr.msk.f32.mxu0 %vm167_vm2, %v472_v39 }
 0x1ee   :  { %429 = vmatmul.mubr.msk.f32.vlgmr.msra.gmra.mrb[2].mxu0 %vm167_vm2, %v474_v40 }
 0x2c1   :  { %v430_v42 = vpop.f32.mrb[2].mxu0 }
 0x2c2   :  { %v344_v43 = vadd.f32 %v430_v42, %v362_v41  ;;  %v338_v44 = vpop.f32.mrb[3].mxu0 }
 0x2c3   :  { %v339_v45 = vadd.f32 %v362_v41, %v338_v44 }
 0x2c4   :  { %348 = vst [vmem:[%s626_s7 + $0x8] sm:$0xff] %v344_v43 }
 0x2c5   :  { %347 = vst [vmem:[%s626_s7] sm:$0xff] %v339_v45 }
 0x2c6   :  { %353 = vsyncpa [#allocation3], 1 }
 0x2c7   :  { %354 = vsyncpa [#allocation5], 1 }

</bundles_post_ra>
